<compile_context>
chip_gen: v7x
topology: tpu7x:2x2x1
jax: 0.10.0
libtpu: 0.0.40
codegen_flags: <defaults>
</compile_context>

<pallas_src>
import functools

import jax
import jax.numpy as jnp
from jax import lax
from jax.experimental import pallas as pl
from jax.experimental.pallas import tpu as pltpu


def _lane_roll(x, off, n):
    """result[..., i] = x[..., (i + off) % n].

    Spelled as two static lane slices + one concat so the semantics (and the
    Mosaic lowering) are unambiguous; the wrapped lanes are zeroed by border
    masks at the call site.  pltpu.roll(x, (-off) % n, axis=-1) is the
    equivalent XLU rotate.
    """
    k = off % n
    if k == 0:
        return x
    return jnp.concatenate([x[:, k:], x[:, :k]], axis=1)


def _unpool_kernel(x_ref, w_ref, out_ref, *, img_h, img_w):
    # x_ref   : (Nb, C, HW)    bf16 input, NCHW-native, spatial flattened on lanes
    # w_ref   : (4P, 9*C + 1)  bf16 fused conv weights; last column is the bias
    # out_ref : (Nb, 4P, HW)   f32 quadrant-packed output (A,B,C,D stacked on channels)
    nb, C, HW = x_ref.shape
    H, W = img_h, img_w
    cdt = x_ref.dtype

    # Border-validity masks, built in-kernel from an iota (no mask input/DMA).
    idx = lax.broadcasted_iota(jnp.int32, (1, HW), 1)
    col = idx % W
    not_top = (idx >= W).astype(cdt)             # output row 0 has no row above
    not_bot = (idx < (H - 1) * W).astype(cdt)    # last row has no row below
    not_left = (col != 0).astype(cdt)            # col 0 has no col to the left
    not_right = (col != W - 1).astype(cdt)       # last col has no col to the right
    vmask = {-1: not_top, 0: None, 1: not_bot}
    hmask = {-1: not_left, 0: None, 1: not_right}

    # (lane offset, combined mask) for the 9 taps, in (kh, kw) row-major order —
    # must match the column order of the packed 2-D weight.
    taps = []
    for dh in (-1, 0, 1):
        for dw in (-1, 0, 1):
            mv, mh = vmask[dh], hmask[dw]
            m = mv if mh is None else (mh if mv is None else mv * mh)
            taps.append((dh * W + dw, m))

    ones_row = jnp.ones((1, HW), cdt)            # bias row of the im2col slab

    # Build the im2col slab fully in vregs (no halo scratch): for every tap,
    # shift the flattened image by the tap offset and zero the wrapped lanes.
    slabs = []
    for b in range(nb):                          # static unroll over the batch block
        xc = x_ref[b]                            # (C, HW)
        rows = []
        for off, m in taps:
            t = _lane_roll(xc, off, HW)
            rows.append(t if m is None else t * m)
        rows.append(ones_row)
        slabs.append(jnp.concatenate(rows, axis=0))                   # (9C+1, HW)
    patch = slabs[0] if nb == 1 else jnp.concatenate(slabs, axis=1)   # (9C+1, Nb*HW)

    # Single fused MXU contraction: all 4 convs, all 9 taps and the bias at once.
    acc = jnp.dot(w_ref[...], patch, preferred_element_type=jnp.float32)  # (4P, Nb*HW)

    for b in range(nb):
        out_ref[b] = acc[:, b * HW:(b + 1) * HW]


def _batch_block(n):
    """Largest per-step batch block that still leaves >= 2 grid steps (v7x: 2 TCs)."""
    best = 1
    for d in range(1, n + 1):
        if n % d == 0 and n // d >= 2:
            best = d
    return best


def unpooling_as_convolution(x_nchw, weights_oihw, biases):
    """Pallas implementation of UnpoolingAsConvolution.forward.

    x_nchw       : (N, C, H, W) float32
    weights_oihw : dict name -> (P, C, KH, KW)  (PyTorch Conv2d weight layout)
    biases       : dict name -> (P,)
    returns      : (N, P, 2H, 2W) float32
    """
    N, C, H, W = x_nchw.shape
    P = weights_oihw["A"].shape[0]
    HW = H * W
    P4 = 4 * P
    K = 9 * C + 1

    # ---- one-time packing (tiny) -------------------------------------------
    # Embed each conv kernel into the unified 3x3 tap grid at its (kh, kw) offset:
    #   A(3x3)->(0,0)  B(2x3)->(1,0)  C(3x2)->(0,1)  D(2x2)->(1,1)
    def pack(name, kh_off, kw_off):
        w = weights_oihw[name].astype(jnp.float32)            # (P, C, kh, kw)
        kh, kw = w.shape[2], w.shape[3]
        return jnp.pad(w, ((0, 0), (0, 0),
                           (kh_off, 3 - kh_off - kh),
                           (kw_off, 3 - kw_off - kw)))        # (P, C, 3, 3)

    # quadrant order [A,B,C,D] == (row offset r, col offset s) = (0,0),(1,0),(0,1),(1,1)
    wq = jnp.stack([pack("A", 0, 0), pack("B", 1, 0),
                    pack("C", 0, 1), pack("D", 1, 1)], axis=0)          # (4, P, C, 3, 3)
    # 2-D fused weight: row = q*P + p, col = (kh*3 + kw)*C + c  (matches the slab rows)
    w2d = jnp.transpose(wq, (0, 1, 3, 4, 2)).reshape(P4, 9 * C)
    bcol = jnp.concatenate([biases["A"], biases["B"], biases["C"],
                            biases["D"]]).astype(jnp.float32).reshape(P4, 1)
    w2d = jnp.concatenate([w2d, bcol], axis=1).astype(jnp.bfloat16)     # (4P, 9C+1)

    # NCHW-native contiguous collapse, bf16 MXU operand (accumulation stays f32).
    x_flat = x_nchw.reshape(N, C, HW).astype(jnp.bfloat16)

    nb = _batch_block(N)
    out = pl.pallas_call(
        functools.partial(_unpool_kernel, img_h=H, img_w=W),
        out_shape=jax.ShapeDtypeStruct((N, P4, HW), jnp.float32),
        grid_spec=pltpu.PrefetchScalarGridSpec(
            num_scalar_prefetch=0,
            grid=(N // nb,),
            in_specs=[
                pl.BlockSpec((nb, C, HW), lambda i: (i, 0, 0)),
                pl.BlockSpec((P4, K), lambda i: (0, 0)),
            ],
            out_specs=pl.BlockSpec((nb, P4, HW), lambda i: (i, 0, 0)),
        ),
        # Per-step VMEM is ~20 KB here; set vmem_limit_bytes explicitly if
        # Nb / H / W are scaled up (v5e scoped default: 16 MiB; v7x VMEM: 64 MiB).
        compiler_params=pltpu.CompilerParams(
            dimension_semantics=("parallel",)),
    )(x_flat, w2d)

    # quadrant interleave: out[n, (2s+r)*P + p, h*W + w] == y[n, p, 2h+r, 2w+s]
    # TODO(synk): emit this interleaved layout from the kernel for large H*W.
    out6 = out.reshape(N, 2, 2, P, H, W)                     # (n, s, r, p, h, w)
    y = jnp.transpose(out6, (0, 3, 4, 2, 5, 1)).reshape(N, P, 2 * H, 2 * W)
    return y


def _reference_forward(x_nchw, weights_oihw, biases):
    """Pure-JAX replica of the PyTorch forward (f32, for verification)."""
    def conv(x, w, b, pad):  # pad = ((top, bottom), (left, right))
        y = lax.conv_general_dilated(
            x, w, window_strides=(1, 1), padding=pad,
            dimension_numbers=("NCHW", "OIHW", "NCHW"),
            precision=lax.Precision.HIGHEST)
        return y + b[None, :, None, None]

    a = conv(x_nchw, weights_oihw["A"], biases["A"], ((1, 1), (1, 1)))
    b_ = conv(x_nchw, weights_oihw["B"], biases["B"], ((0, 1), (1, 1)))
    c = conv(x_nchw, weights_oihw["C"], biases["C"], ((1, 1), (0, 1)))
    d = conv(x_nchw, weights_oihw["D"], biases["D"], ((0, 1), (0, 1)))

    N, P, H, W = a.shape
    left = jnp.stack([a, b_], axis=3).reshape(N, P, 2 * H, W)         # interleave axis=2
    right = jnp.stack([c, d], axis=3).reshape(N, P, 2 * H, W)         # interleave axis=2
    y = jnp.stack([left, right], axis=4).reshape(N, P, 2 * H, 2 * W)  # interleave axis=3
    return y


if __name__ == "__main__":
    N, C, H, W = 2, 4, 16, 16   # x: (N, inplanes, H, W)
    P = 4                       # planes

    key = jax.random.PRNGKey(0)
    keys = jax.random.split(key, 9)
    x = jax.random.normal(keys[0], (N, C, H, W), dtype=jnp.float32)

    kernel_sizes = {"A": (3, 3), "B": (2, 3), "C": (3, 2), "D": (2, 2)}
    weights = {}
    biases = {}
    for idx, (name, (kh, kw)) in enumerate(kernel_sizes.items()):
        wkey, bkey = jax.random.split(keys[idx + 1])
        fan_in = C * kh * kw
        bound = 1.0 / (fan_in ** 0.5)   # same scale as nn.Conv2d default init
        weights[name] = jax.random.uniform(
            wkey, (P, C, kh, kw), jnp.float32, minval=-bound, maxval=bound)
        biases[name] = jax.random.uniform(
            bkey, (P,), jnp.float32, minval=-bound, maxval=bound)

    run = jax.jit(unpooling_as_convolution)
    y = jax.block_until_ready(run(x, weights, biases))

    assert y.shape == (N, P, 2 * H, 2 * W), y.shape

    y_ref = _reference_forward(x, weights, biases)
    max_err = float(jnp.max(jnp.abs(y - y_ref)))
    # bf16 MXU operands (f32 accumulate) vs the pure-f32 reference -> relaxed tolerance.
    if max_err > 5e-2:
        raise AssertionError(f"Pallas kernel mismatch vs reference: max_err={max_err}")

    print("KERNEL_OK")
</pallas_src>

<mosaic_0001>
module attributes {stable_mosaic.version = 11 : i64} {
  func.func @_unpool_kernel(%arg0: i32, %arg1: memref<1x4x256xbf16, #tpu.memory_space<vmem>>, %arg2: memref<16x37xbf16, #tpu.memory_space<vmem>>, %arg3: memref<1x16x256xf32, #tpu.memory_space<vmem>>) attributes {dimension_semantics = [#tpu.dimension_semantics<parallel>], iteration_bounds = array<i64: 2>, scalar_prefetch = 0 : i64, scratch_operands = 0 : i64, tpu.core_type = #tpu.core_type<tc>, window_params = [{transform_indices = @transform_0, window_bounds = array<i64: 1, 4, 256>}, {pipeline_mode = #tpu.pipeline_mode<synchronous>, transform_indices = @transform_1, window_bounds = array<i64: 16, 37>}, {transform_indices = @transform_2, window_bounds = array<i64: 1, 16, 256>}]} {
    %0 = tpu.iota {dimensions = array<i32: 1>} : vector<1x256xi32>
    %c16_i32 = arith.constant 16 : i32
    %c0_i32 = arith.constant 0 : i32
    %1 = arith.cmpi eq, %c16_i32, %c0_i32 : i32
    %c1_i32 = arith.constant 1 : i32
    %2 = arith.select %1, %c1_i32, %c16_i32 : i32
    %3 = vector.broadcast %2 : i32 to vector<1x256xi32>
    %4 = arith.remsi %0, %3 : vector<1x256xi32>
    %c0_i32_0 = arith.constant 0 : i32
    %5 = vector.broadcast %c0_i32_0 : i32 to vector<1x256xi32>
    %6 = arith.cmpi ne, %4, %5 : vector<1x256xi32>
    %c0_i32_1 = arith.constant 0 : i32
    %7 = vector.broadcast %c0_i32_1 : i32 to vector<1x256xi32>
    %8 = arith.cmpi slt, %4, %7 : vector<1x256xi32>
    %c0_i32_2 = arith.constant 0 : i32
    %9 = arith.cmpi slt, %2, %c0_i32_2 : i32
    %10 = vector.broadcast %9 : i1 to vector<1x256xi1>
    %11 = vector.broadcast %10 : vector<1x256xi1> to vector<1x256xi1>
    %12 = arith.xori %8, %11 : vector<1x256xi1>
    %13 = arith.andi %12, %6 : vector<1x256xi1>
    %14 = vector.broadcast %2 : i32 to vector<1x256xi32>
    %15 = arith.addi %4, %14 : vector<1x256xi32>
    %16 = arith.select %13, %15, %4 : vector<1x256xi1>, vector<1x256xi32>
    %c16_i32_3 = arith.constant 16 : i32
    %17 = vector.broadcast %c16_i32_3 : i32 to vector<1x256xi32>
    %18 = arith.cmpi sge, %0, %17 : vector<1x256xi32>
    %19 = arith.extui %18 : vector<1x256xi1> to vector<1x256xi32>
    %20 = arith.sitofp %19 : vector<1x256xi32> to vector<1x256xf32>
    %21 = arith.truncf %20 : vector<1x256xf32> to vector<1x256xbf16>
    %c240_i32 = arith.constant 240 : i32
    %22 = vector.broadcast %c240_i32 : i32 to vector<1x256xi32>
    %23 = arith.cmpi slt, %0, %22 : vector<1x256xi32>
    %24 = arith.extui %23 : vector<1x256xi1> to vector<1x256xi32>
    %25 = arith.sitofp %24 : vector<1x256xi32> to vector<1x256xf32>
    %26 = arith.truncf %25 : vector<1x256xf32> to vector<1x256xbf16>
    %c0_i32_4 = arith.constant 0 : i32
    %27 = vector.broadcast %c0_i32_4 : i32 to vector<1x256xi32>
    %28 = arith.cmpi ne, %16, %27 : vector<1x256xi32>
    %29 = arith.extui %28 : vector<1x256xi1> to vector<1x256xi32>
    %30 = arith.sitofp %29 : vector<1x256xi32> to vector<1x256xf32>
    %31 = arith.truncf %30 : vector<1x256xf32> to vector<1x256xbf16>
    %c15_i32 = arith.constant 15 : i32
    %32 = vector.broadcast %c15_i32 : i32 to vector<1x256xi32>
    %33 = arith.cmpi ne, %16, %32 : vector<1x256xi32>
    %34 = arith.extui %33 : vector<1x256xi1> to vector<1x256xi32>
    %35 = arith.sitofp %34 : vector<1x256xi32> to vector<1x256xf32>
    %36 = arith.truncf %35 : vector<1x256xf32> to vector<1x256xbf16>
    %37 = arith.mulf %21, %31 : vector<1x256xbf16>
    %38 = arith.mulf %21, %36 : vector<1x256xbf16>
    %39 = arith.mulf %26, %31 : vector<1x256xbf16>
    %40 = arith.mulf %26, %36 : vector<1x256xbf16>
    %cst = arith.constant 1.000000e+00 : bf16
    %41 = vector.broadcast %cst : bf16 to vector<1x256xbf16>
    %c0 = arith.constant 0 : index
    %c0_5 = arith.constant 0 : index
    %c0_6 = arith.constant 0 : index
    %42 = vector.load %arg1[%c0, %c0_5, %c0_6] : memref<1x4x256xbf16, #tpu.memory_space<vmem>>, vector<1x4x256xbf16>
    %43 = vector.shape_cast %42 : vector<1x4x256xbf16> to vector<4x256xbf16>
    %44 = vector.extract_strided_slice %43 {offsets = [0, 239], sizes = [4, 17], strides = [1, 1]} : vector<4x256xbf16> to vector<4x17xbf16>
    %45 = vector.extract_strided_slice %43 {offsets = [0, 0], sizes = [4, 239], strides = [1, 1]} : vector<4x256xbf16> to vector<4x239xbf16>
    %46 = tpu.concatenate %44, %45 in 1 : vector<4x17xbf16>, vector<4x239xbf16> -> vector<4x256xbf16>
    %47 = vector.broadcast %37 : vector<1x256xbf16> to vector<4x256xbf16>
    %48 = arith.mulf %46, %47 : vector<4x256xbf16>
    %49 = vector.extract_strided_slice %43 {offsets = [0, 240], sizes = [4, 16], strides = [1, 1]} : vector<4x256xbf16> to vector<4x16xbf16>
    %50 = vector.extract_strided_slice %43 {offsets = [0, 0], sizes = [4, 240], strides = [1, 1]} : vector<4x256xbf16> to vector<4x240xbf16>
    %51 = tpu.concatenate %49, %50 in 1 : vector<4x16xbf16>, vector<4x240xbf16> -> vector<4x256xbf16>
    %52 = vector.broadcast %21 : vector<1x256xbf16> to vector<4x256xbf16>
    %53 = arith.mulf %51, %52 : vector<4x256xbf16>
    %54 = vector.extract_strided_slice %43 {offsets = [0, 241], sizes = [4, 15], strides = [1, 1]} : vector<4x256xbf16> to vector<4x15xbf16>
    %55 = vector.extract_strided_slice %43 {offsets = [0, 0], sizes = [4, 241], strides = [1, 1]} : vector<4x256xbf16> to vector<4x241xbf16>
    %56 = tpu.concatenate %54, %55 in 1 : vector<4x15xbf16>, vector<4x241xbf16> -> vector<4x256xbf16>
    %57 = vector.broadcast %38 : vector<1x256xbf16> to vector<4x256xbf16>
    %58 = arith.mulf %56, %57 : vector<4x256xbf16>
    %59 = vector.extract_strided_slice %43 {offsets = [0, 255], sizes = [4, 1], strides = [1, 1]} : vector<4x256xbf16> to vector<4x1xbf16>
    %60 = vector.extract_strided_slice %43 {offsets = [0, 0], sizes = [4, 255], strides = [1, 1]} : vector<4x256xbf16> to vector<4x255xbf16>
    %61 = tpu.concatenate %59, %60 in 1 : vector<4x1xbf16>, vector<4x255xbf16> -> vector<4x256xbf16>
    %62 = vector.broadcast %31 : vector<1x256xbf16> to vector<4x256xbf16>
    %63 = arith.mulf %61, %62 : vector<4x256xbf16>
    %64 = vector.extract_strided_slice %43 {offsets = [0, 1], sizes = [4, 255], strides = [1, 1]} : vector<4x256xbf16> to vector<4x255xbf16>
    %65 = vector.extract_strided_slice %43 {offsets = [0, 0], sizes = [4, 1], strides = [1, 1]} : vector<4x256xbf16> to vector<4x1xbf16>
    %66 = tpu.concatenate %64, %65 in 1 : vector<4x255xbf16>, vector<4x1xbf16> -> vector<4x256xbf16>
    %67 = vector.broadcast %36 : vector<1x256xbf16> to vector<4x256xbf16>
    %68 = arith.mulf %66, %67 : vector<4x256xbf16>
    %69 = vector.extract_strided_slice %43 {offsets = [0, 15], sizes = [4, 241], strides = [1, 1]} : vector<4x256xbf16> to vector<4x241xbf16>
    %70 = vector.extract_strided_slice %43 {offsets = [0, 0], sizes = [4, 15], strides = [1, 1]} : vector<4x256xbf16> to vector<4x15xbf16>
    %71 = tpu.concatenate %69, %70 in 1 : vector<4x241xbf16>, vector<4x15xbf16> -> vector<4x256xbf16>
    %72 = vector.broadcast %39 : vector<1x256xbf16> to vector<4x256xbf16>
    %73 = arith.mulf %71, %72 : vector<4x256xbf16>
    %74 = vector.extract_strided_slice %43 {offsets = [0, 16], sizes = [4, 240], strides = [1, 1]} : vector<4x256xbf16> to vector<4x240xbf16>
    %75 = vector.extract_strided_slice %43 {offsets = [0, 0], sizes = [4, 16], strides = [1, 1]} : vector<4x256xbf16> to vector<4x16xbf16>
    %76 = tpu.concatenate %74, %75 in 1 : vector<4x240xbf16>, vector<4x16xbf16> -> vector<4x256xbf16>
    %77 = vector.broadcast %26 : vector<1x256xbf16> to vector<4x256xbf16>
    %78 = arith.mulf %76, %77 : vector<4x256xbf16>
    %79 = vector.extract_strided_slice %43 {offsets = [0, 17], sizes = [4, 239], strides = [1, 1]} : vector<4x256xbf16> to vector<4x239xbf16>
    %80 = vector.extract_strided_slice %43 {offsets = [0, 0], sizes = [4, 17], strides = [1, 1]} : vector<4x256xbf16> to vector<4x17xbf16>
    %81 = tpu.concatenate %79, %80 in 1 : vector<4x239xbf16>, vector<4x17xbf16> -> vector<4x256xbf16>
    %82 = vector.broadcast %40 : vector<1x256xbf16> to vector<4x256xbf16>
    %83 = arith.mulf %81, %82 : vector<4x256xbf16>
    %84 = tpu.concatenate %48, %53, %58, %63, %43, %68, %73, %78, %83, %41 in 0 : vector<4x256xbf16>, vector<4x256xbf16>, vector<4x256xbf16>, vector<4x256xbf16>, vector<4x256xbf16>, vector<4x256xbf16>, vector<4x256xbf16>, vector<4x256xbf16>, vector<4x256xbf16>, vector<1x256xbf16> -> vector<37x256xbf16>
    %c0_7 = arith.constant 0 : index
    %c0_8 = arith.constant 0 : index
    %85 = vector.load %arg2[%c0_7, %c0_8] : memref<16x37xbf16, #tpu.memory_space<vmem>>, vector<16x37xbf16>
    %cst_9 = arith.constant dense<0.000000e+00> : vector<16x256xf32>
    %86 = tpu.matmul %85, %84, %cst_9 {dimension_numbers = #tpu.dot_dimension_numbers<[1], [0], [0], [1], [0, 0, 1, 1], [], []>} : vector<16x37xbf16>, vector<37x256xbf16>, vector<16x256xf32> -> vector<16x256xf32>
    %c0_10 = arith.constant 0 : index
    %c0_11 = arith.constant 0 : index
    %c0_12 = arith.constant 0 : index
    %87 = vector.load %arg3[%c0_10, %c0_11, %c0_12] : memref<1x16x256xf32, #tpu.memory_space<vmem>>, vector<1x16x256xf32>
    %88 = vector.shape_cast %87 : vector<1x16x256xf32> to vector<16x256xf32>
    %89 = vector.shape_cast %86 : vector<16x256xf32> to vector<1x16x256xf32>
    tpu.vector_store %arg3[%c0_10, %c0_11, %c0_12], %89 {strides = array<i32>} : memref<1x16x256xf32, #tpu.memory_space<vmem>>, vector<1x16x256xf32>,
    return
  }
  func.func @transform_0(%arg0: i32) -> (i32, i32, i32) {
    %c0_i32 = arith.constant 0 : i32
    %c0_i32_0 = arith.constant 0 : i32
    %c0_i32_1 = arith.constant 0 : i32
    return %arg0, %c0_i32, %c0_i32_0 : i32, i32, i32
  }
  func.func @transform_1(%arg0: i32) -> (i32, i32) {
    %c0_i32 = arith.constant 0 : i32
    %c0_i32_0 = arith.constant 0 : i32
    %c0_i32_1 = arith.constant 0 : i32
    return %c0_i32, %c0_i32_0 : i32, i32
  }
  func.func @transform_2(%arg0: i32) -> (i32, i32, i32) {
    %c0_i32 = arith.constant 0 : i32
    %c0_i32_0 = arith.constant 0 : i32
    %c0_i32_1 = arith.constant 0 : i32
    return %arg0, %c0_i32, %c0_i32_0 : i32, i32, i32
  }
}

</mosaic_0001>

<bundles_post_ra>
// kernel: unpooling_as_convolution.1
= control target key start
LH: loop header
LB: loop body
LE: loop exit
PB: predicated region body
PF: predicated region fallthrough
CT: control target
= control target key end

     0   :  { %s595_s9 = smov 0   ;;  %s689_s0 = inlined_call_operand.vmem [shape: bf16[2,4,256], index: 0, kind: input, shape index: {}]   ;;  %s690_s1 = inlined_call_operand.vmem [shape: bf16[16,37], index: 1, kind: input, shape index: {}]   ;;  %s691_s2 = inlined_call_operand.vmem [shape: f32[2,16,256], index: 2, kind: output, shape index: {}]  }
   0x1 LB: > { %s519_s10 = sadd.s32 4294967295, %s567_s9   ;;  %p523_p0 = scmp.ge.s32.totalorder %s567_s9, 1  ;;  %s567_s9 = sphi %s595_s9, %s12_s9  }
   0x2   : > { %p112_p1 = scmp.lt.s32.totalorder %s567_s9, 3 }
   0x4   : > { %p113_p2 = pnand %p523_p0, %p112_p1 }
   0x5   : > { %p134_p3 = scmp.lt.s32.totalorder (!%p113_p2), %s519_s10, 1  ;;  %s569_s15 = smov (!%p113_p2), 15   ;;  %v575_v2 = vmov (!%p113_p2), 0   ;;  %v146_v3 = vlaneseq (!%p113_p2)  ;;  %v578_v8 = vmov (!%p113_p2), 0.0   ;;  %vm241_vm5 = vcmask (!%p113_p2), 130048  }
   0x6   : > { %116 = sbr.rel (%p113_p2) target bundleno = 386 (0x182), region = 28  ;;  %s570_s16 = smov (!%p113_p2), 16   ;;  %449 = vmatprep.mubr.bf16.mxu0 (!%p113_p2), %v575_v2  ;;  %vm255_vm6 = vcmask (!%p113_p2), 121856   ;;  %vm227_vm7 = vcmask (!%p113_p2), 138240   ;;  %vm269_vm9 = vcmask (!%p113_p2), 7168   ;;  %vm359_vm10 = vcmask (!%p113_p2), 1041408  }
   0x7   : > { %s571_s17 = smov (!%p113_p2), 17   ;;  %s572_s18 = smov (!%p113_p2), 1   ;;  %v147_v4 = vand.u32 (!%p113_p2), 127, %v146_v3  ;;  %vm366_vm11 = vcmask (!%p113_p2), 1043456   ;;  %vm283_vm12 = vcmask (!%p113_p2), 1039360   ;;  %vm371_vm13 = vcmask (!%p113_p2), 1045504  }
   0x8   : > { %s573_s19 = smov (!%p113_p2), 127   ;;  %s574_s20 = smov (!%p113_p2), 113   ;;  %vm297_vm14 = vcmask (!%p113_p2), 924672   ;;  %vm311_vm15 = vcmask (!%p113_p2), 916480  }
   0x9   : > { %s576_s21 = smov (!%p113_p2), 112   ;;  %s577_s22 = smov (!%p113_p2), 111   ;;  %v148_v5 = vadd.s32 (!%p113_p2), 128, %v147_v4  ;;  %v153_v6 = vand.u32 (!%p113_p2), 15, %v147_v4  ;;  %vm173_vm4 = vcmp.ge.s32.totalorder (!%p113_p2), %v147_v4, 16 }
   0xa   : > { %v528_v15 = vsel (!%p113_p2), %vm173_vm4, 1.0, %v578_v8 }
   0xb   : > { %v160_v7 = vand.u32 (!%p113_p2), 15, %v148_v5  ;;  %vm197_vm0 = vcmp.ne.s32.totalorder (!%p113_p2), %v153_v6, 15  ;;  %vm189_vm2 = vcmp.ne.s32.totalorder (!%p113_p2), %v153_v6, 0  ;;  %v179_v21 = vpack.c.bf16 (!%p113_p2), %v528_v15, %v528_v15 }
   0xc   : > { %v532_v9 = vsel (!%p113_p2), %vm197_vm0, 1.0, %v578_v8  ;;  %v530_v11 = vsel (!%p113_p2), %vm189_vm2, 1.0, %v578_v8  ;;  %vm182_vm8 = vcmp.lt.s32.totalorder (!%p113_p2), %v148_v5, 240  ;;  %vm410_vm0 = vcmask (!%p113_p2), 1042432  }
   0xd   : > { %s693_s10 = smov (!%p134_p3, %s519_s10), 1  ;;  %vm198_vm1 = vcmp.ne.s32.totalorder %v160_v7, 15  ;;  %vm190_vm3 = vcmp.ne.s32.totalorder %v160_v7, 0  ;;  %v631_v16 = vpack.c.bf16 %v532_v9, %v532_v9  ;;  %v635_v18 = vpack.c.bf16 %v530_v11, %v530_v11 }
   0xe   : > { %s539_s11 = sshll.u32 %s693_s10, 2  ;;  %v533_v10 = vsel %vm198_vm1, 1.0, %v578_v8  ;;  %v531_v12 = vsel %vm190_vm3, 1.0, %v578_v8  ;;  %v529_v33 = vsel %vm182_vm8, 1.0, %v578_v8  ;;  %vm325_vm1 = vcmask 908288   ;;  %s540_s25 = sshll.u32 %s693_s10, 5 }
   0xf   : > { %s138_s14 = scalar_lea.vmem %s689_s0, %s539_s11  ;;  %v633_v17 = vpack.c.bf16 %v533_v10, %v533_v10  ;;  %v637_v19 = vpack.c.bf16 %v531_v12, %v531_v12  ;;  %v207_v25 = vmul.bf16 %v631_v16, %v179_v21  ;;  %v205_v27 = vmul.bf16 %v635_v18, %v179_v21  ;;  %s143_s28 = scalar_lea.vmem %s691_s2, %s540_s25 }
  0x10   : > { %v609_v0 = vld.sshfl [vmem:[%s138_s14] sm:$0x33 pattern:$0x76325410]  ;;  %v645_v46 = vpack.c.bf16 %v529_v33, %v529_v33  ;;  %v209_v59 = vmul.bf16 1.0|1.0, %v635_v18 }
  0x11   : > { %253 = vrot.lane.b32.xlu1 %v609_v0, %s569_s15  ;;  %239 = vrot.lane.b32.xlu0 %v609_v0, %s570_s16  ;;  %v615_v1 = vcombine.high %v609_v0, %v609_v0  ;;  %v208_v26 = vmul.bf16 1.0|1.0, %v633_v17  ;;  %v206_v28 = vmul.bf16 1.0|1.0, %v637_v19  ;;  %vm406_vm2 = vcmask 302080  }
  0x12   : > { %v210_v4 = vmul.bf16 %v637_v19, %v645_v46 }
  0x15   : > { %225 = vrot.lane.b32.xlu1 %v609_v0, %s571_s17  ;;  %237 = vrot.lane.b32.xlu0 %v615_v1, %s570_s16 }
  0x19   : > { %251 = vrot.lane.b32.xlu1 %v615_v1, %s569_s15  ;;  %223 = vrot.lane.b32.xlu0 %v615_v1, %s571_s17 }
  0x1d   : > { %267 = vrot.lane.b32.xlu1 %v609_v0, %s572_s18  ;;  %265 = vrot.lane.b32.xlu0 %v615_v1, %s572_s18 }
  0x21   : > { %281 = vrot.lane.b32.xlu1 %v615_v1, %s573_s19  ;;  %279 = vrot.lane.b32.xlu0 %v609_v0, %s573_s19 }
  0x25   : > { %295 = vrot.lane.b32.xlu1 %v615_v1, %s574_s20  ;;  %293 = vrot.lane.b32.xlu0 %v609_v0, %s574_s20 }
  0x29   : > { %309 = vrot.lane.b32.xlu1 %v615_v1, %s576_s21  ;;  %307 = vrot.lane.b32.xlu0 %v609_v0, %s576_s21 }
  0x2d   : > { %323 = vrot.lane.b32.xlu1 %v615_v1, %s577_s22  ;;  %321 = vrot.lane.b32.xlu0 %v609_v0, %s577_s22 }
  0x83   : > { %v254_v13 = vpop.permute.xlu1 %253  ;;  %v240_v14 = vpop.permute.xlu0 %239 }
  0x87   : > { %v226_v20 = vpop.permute.xlu1 %225  ;;  %v238_v22 = vpop.permute.xlu0 %237 }
  0x88   : > { %v242_v23 = vsel %vm241_vm5, %v240_v14, %v238_v22  ;;  %v247_v24 = vsel %vm241_vm5, %v238_v22, %v240_v14 }
  0x89   : > { %v249_v29 = vmul.bf16 %v247_v24, %v179_v21  ;;  %v250_v30 = vmul.bf16 1.0|1.0, %v242_v23 }
  0x8b   : > { %v252_v31 = vpop.permute.xlu1 %251  ;;  %v224_v32 = vpop.permute.xlu0 %223  ;;  %v337_v42 = vrot.slane %v249_v29, 6  ;;  %v338_v43 = vrot.slane %v250_v30, 6 }
  0x8c   : > { %v256_v34 = vsel %vm255_vm6, %v254_v13, %v252_v31  ;;  %v261_v35 = vsel %vm255_vm6, %v252_v31, %v254_v13  ;;  %v228_v36 = vsel %vm227_vm7, %v226_v20, %v224_v32  ;;  %v233_v37 = vsel %vm227_vm7, %v224_v32, %v226_v20 }
  0x8d   : > { %v263_v38 = vmul.bf16 %v261_v35, %v207_v25  ;;  %v264_v39 = vmul.bf16 %v256_v34, %v208_v26  ;;  %v235_v40 = vmul.bf16 %v233_v37, %v205_v27  ;;  %v236_v41 = vmul.bf16 %v228_v36, %v206_v28 }
  0x8e   : > { %v211_v13 = vmul.bf16 1.0|1.0, %v631_v16  ;;  %v579_v20 = vmov 65535   ;;  %v212_v28 = vmul.bf16 %v633_v17, %v645_v46 }
  0x8f   : > { %v268_v44 = vpop.permute.xlu1 %267  ;;  %v266_v45 = vpop.permute.xlu0 %265  ;;  %v341_v47 = vrot.slane %v263_v38, 4  ;;  %v342_v48 = vrot.slane %v264_v39, 4  ;;  %v365_v53 = vsel %vm359_vm10, %v236_v41, %v338_v43  ;;  %v362_v54 = vsel %vm359_vm10, %v235_v40, %v337_v42 }
  0x90   : > { %v270_v49 = vsel %vm269_vm9, %v268_v44, %v266_v45  ;;  %v275_v50 = vsel %vm269_vm9, %v266_v45, %v268_v44  ;;  %v411_v21 = vsel %vm359_vm10, 4294967295, %v579_v20  ;;  %v560_v44 = vld [vmem:[%s690_s1] sm:$0xff]  }
  0x91   : > { %v277_v51 = vmul.bf16 %v275_v50, %v635_v18  ;;  %v278_v52 = vmul.bf16 %v270_v49, %v637_v19  ;;  %v370_v62 = vsel %vm366_vm11, %v365_v53, %v342_v48  ;;  %v368_v63 = vsel %vm366_vm11, %v362_v54, %v341_v47 }
  0x93   : > { %v345_v55 = vrot.slane %v277_v51, 2  ;;  %v346_v56 = vrot.slane %v278_v52, 2  ;;  %v282_v57 = vpop.permute.xlu1 %281  ;;  %v280_v58 = vpop.permute.xlu0 %279 }
  0x94   : > { %v284_v60 = vsel %vm283_vm12, %v280_v58, %v282_v57  ;;  %v289_v61 = vsel %vm283_vm12, %v282_v57, %v280_v58 }
  0x95   : > { %v376_v2 = vsel %vm371_vm13, %v370_v62, %v346_v56  ;;  %v373_v3 = vsel %vm371_vm13, %v368_v63, %v345_v55  ;;  %v291_v5 = vmul.bf16 %v284_v60, %v631_v16  ;;  %v292_v6 = vmul.bf16 %v289_v61, %v633_v17 }
  0x96   : > { %417 = vmatprep.subr.bf16.mxu0 %v376_v2  ;;  %v412_v16 = vsel %vm410_vm0, %v411_v21, 0 }
  0x97   : > { %v296_v7 = vpop.permute.xlu1 %295  ;;  %418 = vmatpush1.bf16.msra.mxu0 %v373_v3  ;;  %v294_v8 = vpop.permute.xlu0 %293  ;;  %v349_v14 = vrot.slane %v291_v5, 6  ;;  %v350_v15 = vrot.slane %v292_v6, 6 }
  0x98   : > { %v298_v9 = vsel %vm297_vm14, %v294_v8, %v296_v7  ;;  %v303_v10 = vsel %vm297_vm14, %v296_v7, %v294_v8 }
  0x99   : > { %v305_v11 = vmul.bf16 %v298_v9, %v209_v59  ;;  %v306_v12 = vmul.bf16 %v303_v10, %v210_v4  ;;  %v383_v33 = vsel %vm359_vm10, %v615_v1, %v350_v15  ;;  %v380_v34 = vsel %vm359_vm10, %v609_v0, %v349_v14 }
  0x9b   : > { %v310_v18 = vpop.permute.xlu1 %309  ;;  %v308_v19 = vpop.permute.xlu0 %307  ;;  %v353_v22 = vrot.slane %v305_v11, 4  ;;  %v354_v23 = vrot.slane %v306_v12, 4 }
  0x9c   : > { %v312_v24 = vsel %vm311_vm15, %v308_v19, %v310_v18  ;;  %v317_v25 = vsel %vm311_vm15, %v310_v18, %v308_v19 }
  0x9d   : > { %v319_v26 = vmul.bf16 1.0|1.0, %v312_v24  ;;  %v320_v27 = vmul.bf16 %v317_v25, %v645_v46  ;;  %v387_v37 = vsel %vm366_vm11, %v383_v33, %v354_v23  ;;  %v385_v38 = vsel %vm366_vm11, %v380_v34, %v353_v22 }
  0x9f   : > { %v357_v29 = vrot.slane %v319_v26, 2  ;;  %v358_v30 = vrot.slane %v320_v27, 2  ;;  %v324_v31 = vpop.permute.xlu1 %323  ;;  %v322_v32 = vpop.permute.xlu0 %321 }
  0xa0   : > { %v326_v35 = vsel %vm325_vm1, %v322_v32, %v324_v31  ;;  %v331_v36 = vsel %vm325_vm1, %v324_v31, %v322_v32 }
  0xa1   : > { %v333_v17 = vmul.bf16 %v326_v35, %v211_v13  ;;  %v334_v39 = vmul.bf16 %v331_v36, %v212_v28  ;;  %v392_v40 = vsel %vm371_vm13, %v387_v37, %v358_v30  ;;  %v389_v41 = vsel %vm371_vm13, %v385_v38, %v357_v29 }
  0xa2   : > { %419 = vmatprep.subr.bf16.mxu0 %v392_v40 }
  0xa3   : > { %v396_v42 = vsel %vm359_vm10, %v333_v17, 1065369472  ;;  %v398_v1 = vsel %vm359_vm10, %v334_v39, 1065369472  ;;  %420 = vmatpush1.bf16.msra.mxu0 %v389_v41 }
  0xa4   : > { %v415_v0 = vand.u32 %v412_v16, %v398_v1  ;;  %v413_v43 = vand.u32 %v412_v16, %v396_v42 }
  0xa6   : > { %421 = vmatprep.subr.bf16.mxu0 %v415_v0 }
  0xa7   : > { %422 = vmatpush1.bf16.msra.mxu0 %v413_v43 }
  0xaa   : > { %536 = vmatmul.mubr.msk.bf16.vlgmr.msra.gmra.mrb[0].mxu0 %vm406_vm2, %v560_v44 }
 0x17d   : > { %v451_v45 = vpop.f32.mrb[0].mxu0 }
 0x17e   : > { %460 = vst [vmem:[%s143_s28] sm:$0xff] %v451_v45  ;;  %v453_v46 = vpop.f32.mrb[1].mxu0 }
 0x17f   : > { %461 = vst [vmem:[%s143_s28 + $0x8] sm:$0xff] %v453_v46  ;;  %v455_v47 = vpop.f32.mrb[2].mxu0 }
 0x180   : > { %462 = vst [vmem:[%s143_s28 + $0x10] sm:$0xff] %v455_v47  ;;  %v457_v48 = vpop.f32.mrb[3].mxu0 }
 0x181   : > { %463 = vst [vmem:[%s143_s28 + $0x18] sm:$0xff] %v457_v48 }
 0x182 PF: > { %s12_s9 = sadd.s32 1, %s567_s9  }
 0x183   : > { %p9_p4 = scmp.ge.s32.totalorder %s12_s9, 4  }
 0x185   :  { %11 = sbr.rel (!%p9_p4) target bundleno = 1 (0x1), region = 58 }

</bundles_post_ra>
